<compile_context>
chip_gen: v7x
topology: tpu7x:2x2x1
jax: 0.10.0
libtpu: 0.0.40
codegen_flags: <defaults>
</compile_context>

<pallas_src>
import math
import functools

import jax
import jax.numpy as jnp
import numpy as np
from jax.experimental import pallas as pl
from jax.experimental.pallas import tpu as pltpu


# ----------------------------------------------------------------------------
# Kernel 1: fused, tiled QKV projection   qkv = x @ Wqkv + b
#   x: [M, K], Wqkv: [K, 3E], b: [1, 3E]  ->  qkv: [M, 3E]
# ----------------------------------------------------------------------------
def _qkv_linear_kernel(x_ref, w_ref, b_ref, o_ref, acc_ref):
    @pl.when(pl.program_id(2) == 0)
    def _():
        acc_ref[...] = jnp.zeros_like(acc_ref)

    acc_ref[...] += jnp.dot(x_ref[...], w_ref[...],
                            preferred_element_type=jnp.float32)

    @pl.when(pl.program_id(2) == pl.num_programs(2) - 1)
    def _():
        o_ref[...] = (acc_ref[...] + b_ref[...]).astype(o_ref.dtype)


def _pick_tile(dim, pref):
    """Tile = pref when it evenly divides dim, else the full dim (toy-size safe)."""
    return pref if dim % pref == 0 else dim


def qkv_projection(x2d, w_qkv, b_qkv):
    M, K = x2d.shape
    _, N = w_qkv.shape
    tm = _pick_tile(M, 256)
    tn = _pick_tile(N, 128)   # keep output blocks lane-dense (multiples of 128)
    tk = _pick_tile(K, 512)
    grid = (M // tm, N // tn, K // tk)
    return pl.pallas_call(
        _qkv_linear_kernel,
        grid=grid,
        in_specs=[
            pl.BlockSpec((tm, tk), lambda i, j, k: (i, k)),
            pl.BlockSpec((tk, tn), lambda i, j, k: (k, j)),
            pl.BlockSpec((1, tn), lambda i, j, k: (0, j)),
        ],
        out_specs=pl.BlockSpec((tm, tn), lambda i, j, k: (i, j)),
        out_shape=jax.ShapeDtypeStruct((M, N), jnp.float32),
        scratch_shapes=[pltpu.VMEM((tm, tn), jnp.float32)],
        compiler_params=pltpu.CompilerParams(
            dimension_semantics=("parallel", "parallel", "arbitrary"),
            vmem_limit_bytes=48 * 1024 * 1024),
    )(x2d, w_qkv, b_qkv)


# ----------------------------------------------------------------------------
# Kernel 2: fused RoPE + multi-head attention, one batch element per grid step
#   qkv block: [1, S, 3E]  (q | k | v packed along lanes, as produced by kernel 1)
#   cos/sin:   [S, E]      (per-head-tiled, repeat_interleave'd tables)
#   outputs:   ctx [1, S, E]  (lane-dense, already in final [B,S,E] layout)
#              scores [1, H, S, S]  (pre-softmax, scaled — matches torch return)
# ----------------------------------------------------------------------------
def _rope_attn_kernel(qkv_ref, cos_ref, sin_ref, ctx_ref, scores_ref, *,
                      num_heads, head_dim, inv_scale):
    S = qkv_ref.shape[1]
    E = num_heads * head_dim
    D = head_dim

    qkv = qkv_ref[0]                      # [S, 3E]
    q = qkv[:, 0:E]                       # [S, E]
    k = qkv[:, E:2 * E]
    v = qkv[:, 2 * E:3 * E]
    cos = cos_ref[...]                    # [S, E]
    sin = sin_ref[...]

    # RoPE pair swap without the MXU:
    #   x2[:, 2i] = -x[:, 2i+1]   (even lanes take the next lane, negated)
    #   x2[:, 2i+1] =  x[:, 2i]   (odd  lanes take the previous lane)
    # Rolls are circular over the full E lane axis, but head boundaries sit at even
    # lanes so every selected neighbor stays inside its own (even, odd) pair / head.
    lane = jax.lax.broadcasted_iota(jnp.int32, (S, E), 1)
    is_even = (lane & 1) == 0

    def rope(x):
        nxt = pltpu.roll(x, shift=E - 1, axis=1)   # nxt[:, j] = x[:, (j+1) % E]
        prv = pltpu.roll(x, shift=1, axis=1)       # prv[:, j] = x[:, (j-1) % E]
        x2 = jnp.where(is_even, -nxt, prv)
        return x * cos + x2 * sin

    # Fold the 1/sqrt(all_head_size) scale into q_rot (S*E muls instead of H*S*S).
    q_rot = rope(q) * inv_scale
    k_rot = rope(k)

    ctx_heads = []
    for h in range(num_heads):            # static unroll; H is small
        qh = q_rot[:, h * D:(h + 1) * D]  # [S, D]
        kh = k_rot[:, h * D:(h + 1) * D]
        vh = v[:, h * D:(h + 1) * D]

        # scores_h = (q_rot * inv_scale) @ k_rot^T
        s = jax.lax.dot_general(qh, kh, (((1,), (1,)), ((), ())),
                                preferred_element_type=jnp.float32)   # [S, S]
        scores_ref[0, h] = s.astype(scores_ref.dtype)

        # softmax (EUP reciprocal) + PV
        m = jnp.max(s, axis=-1, keepdims=True)
        e = jnp.exp(s - m)
        p = e * pl.reciprocal(jnp.sum(e, axis=-1, keepdims=True), approx=True)
        ctx_heads.append(jnp.dot(p, vh, preferred_element_type=jnp.float32))

    # Single lane-dense [S, E] store (== torch permute(0,2,1,3).view(B,S,E) layout).
    ctx_ref[0] = jnp.concatenate(ctx_heads, axis=1).astype(ctx_ref.dtype)


def rope_attention(qkv3, cos_full, sin_full, num_heads, head_dim, all_head_size):
    B, S, _ = qkv3.shape
    E = num_heads * head_dim
    inv_scale = 1.0 / math.sqrt(all_head_size)
    kernel = functools.partial(_rope_attn_kernel, num_heads=num_heads,
                               head_dim=head_dim, inv_scale=inv_scale)
    ctx, scores = pl.pallas_call(
        kernel,
        grid=(B,),
        in_specs=[
            pl.BlockSpec((1, S, 3 * E), lambda b: (b, 0, 0)),   # packed q|k|v
            pl.BlockSpec((S, E), lambda b: (0, 0)),             # cos (per-head tiled)
            pl.BlockSpec((S, E), lambda b: (0, 0)),             # sin
        ],
        out_specs=[
            pl.BlockSpec((1, S, E), lambda b: (b, 0, 0)),               # context
            pl.BlockSpec((1, num_heads, S, S), lambda b: (b, 0, 0, 0)),  # scores
        ],
        out_shape=(
            jax.ShapeDtypeStruct((B, S, E), jnp.float32),
            # NOTE: could be bf16 to halve scores writeback if caller tolerates it.
            jax.ShapeDtypeStruct((B, num_heads, S, S), jnp.float32),
        ),
        compiler_params=pltpu.CompilerParams(
            dimension_semantics=("parallel",),
            vmem_limit_bytes=48 * 1024 * 1024),
    )(qkv3, cos_full, sin_full)
    return ctx, scores


# ----------------------------------------------------------------------------
# Full module forward
# ----------------------------------------------------------------------------
def multi_heads_attention(inputs, params, num_heads):
    """inputs: [B, S, E] f32. Returns (context [B,S,E], attention_scores [B,H,S,S])."""
    B, S, E = inputs.shape
    H = num_heads
    D = E // H
    all_head_size = H * D

    # Fused QKV weights: one [E, 3E] matmul instead of three [E, E] launches.
    w_qkv = jnp.concatenate([params["wq"], params["wk"], params["wv"]], axis=1)  # [E, 3E]
    b_qkv = jnp.concatenate([params["bq"], params["bk"], params["bv"]])[None, :]  # [1, 3E]

    qkv = qkv_projection(inputs.reshape(B * S, E), w_qkv, b_qkv)   # [B*S, 3E]
    qkv3 = qkv.reshape(B, S, 3 * E)                                # metadata-only reshape

    # Sinusoidal RoPE tables (interleave-repeated), tiled across heads so the kernel
    # works directly in the packed [S, E] lane layout.
    pos = jnp.arange(S, dtype=jnp.float32)
    idx = jnp.arange(D // 2, dtype=jnp.float32)
    inv_freq = jnp.power(10000.0, -2.0 * idx / D)
    ang = pos[:, None] * inv_freq[None, :]                  # [S, D/2]
    cos_pos = jnp.repeat(jnp.cos(ang), 2, axis=-1)          # [S, D]
    sin_pos = jnp.repeat(jnp.sin(ang), 2, axis=-1)          # [S, D]
    cos_full = jnp.tile(cos_pos, (1, H))                    # [S, E]
    sin_full = jnp.tile(sin_pos, (1, H))                    # [S, E]

    ctx, scores = rope_attention(qkv3, cos_full, sin_full, H, D, all_head_size)
    # ctx is already [B, S, all_head_size] — no transpose/reshape needed.
    return ctx, scores


# ----------------------------------------------------------------------------
# Pure-JAX reference (mirrors the torch module) for the correctness check
# ----------------------------------------------------------------------------
def reference(inputs, params, num_heads):
    B, S, E = inputs.shape
    H, D = num_heads, E // num_heads
    hp = jax.lax.Precision.HIGHEST
    x2d = inputs.reshape(B * S, E)

    def proj(w, b):
        y = jnp.dot(x2d, w, precision=hp) + b
        return y.reshape(B, S, H, D).transpose(0, 2, 1, 3)

    q = proj(params["wq"], params["bq"])
    k = proj(params["wk"], params["bk"])
    v = proj(params["wv"], params["bv"])

    pos = jnp.arange(S, dtype=jnp.float32)
    idx = jnp.arange(D // 2, dtype=jnp.float32)
    inv_freq = jnp.power(10000.0, -2.0 * idx / D)
    ang = pos[:, None] * inv_freq[None, :]
    cos_pos = jnp.repeat(jnp.cos(ang), 2, axis=-1)[None, None]   # [1,1,S,D]
    sin_pos = jnp.repeat(jnp.sin(ang), 2, axis=-1)[None, None]

    def rot(t):
        t2 = jnp.stack([-t[..., 1::2], t[..., ::2]], axis=-1).reshape(t.shape)
        return t * cos_pos + t2 * sin_pos

    qr, kr = rot(q), rot(k)
    scores = jnp.einsum("bhqd,bhkd->bhqk", qr, kr, precision=hp) / math.sqrt(E)
    probs = jax.nn.softmax(scores, axis=-1)
    ctx = jnp.einsum("bhqk,bhkd->bhqd", probs, v, precision=hp)
    return ctx.transpose(0, 2, 1, 3).reshape(B, S, E), scores


if __name__ == "__main__":
    # args: embedding_size=128, num_attention_heads=4, attention_dropout_prob=0.0
    B, S, E, H = 2, 8, 128, 4

    key = jax.random.PRNGKey(0)
    k_x, k_wq, k_wk, k_wv, k_bq, k_bk, k_bv = jax.random.split(key, 7)
    scale = 1.0 / math.sqrt(E)
    params = {
        "wq": jax.random.normal(k_wq, (E, E), jnp.float32) * scale,
        "wk": jax.random.normal(k_wk, (E, E), jnp.float32) * scale,
        "wv": jax.random.normal(k_wv, (E, E), jnp.float32) * scale,
        "bq": jax.random.normal(k_bq, (E,), jnp.float32) * 0.01,
        "bk": jax.random.normal(k_bk, (E,), jnp.float32) * 0.01,
        "bv": jax.random.normal(k_bv, (E,), jnp.float32) * 0.01,
    }
    x = jax.random.normal(k_x, (B, S, E), jnp.float32)

    fwd = jax.jit(multi_heads_attention, static_argnums=2)
    ctx, scores = fwd(x, params, H)
    ctx = jax.block_until_ready(ctx)
    scores = jax.block_until_ready(scores)

    ctx_ref, scores_ref = reference(x, params, H)
    np.testing.assert_allclose(np.asarray(scores), np.asarray(scores_ref),
                               atol=5e-4, rtol=5e-4)
    # ctx tolerance absorbs the approx (EUP) reciprocal in the softmax denominator.
    np.testing.assert_allclose(np.asarray(ctx), np.asarray(ctx_ref),
                               atol=2e-3, rtol=2e-3)

    print("KERNEL_OK")
</pallas_src>

<mosaic_0001>
module attributes {stable_mosaic.version = 11 : i64} {
  func.func @_qkv_linear_kernel(%arg0: i32, %arg1: i32, %arg2: i32, %arg3: memref<16x128xf32, #tpu.memory_space<vmem>>, %arg4: memref<128x128xf32, #tpu.memory_space<vmem>>, %arg5: memref<1x128xf32, #tpu.memory_space<vmem>>, %arg6: memref<16x128xf32, #tpu.memory_space<vmem>>, %arg7: memref<16x128xf32, #tpu.memory_space<vmem>>) attributes {dimension_semantics = [#tpu.dimension_semantics<parallel>, #tpu.dimension_semantics<parallel>, #tpu.dimension_semantics<arbitrary>], iteration_bounds = array<i64: 1, 3, 1>, scalar_prefetch = 0 : i64, scratch_operands = 1 : i64, tpu.core_type = #tpu.core_type<tc>, window_params = [{transform_indices = @transform_0, window_bounds = array<i64: 16, 128>}, {transform_indices = @transform_1, window_bounds = array<i64: 128, 128>}, {transform_indices = @transform_2, window_bounds = array<i64: 1, 128>}, {transform_indices = @transform_3, window_bounds = array<i64: 16, 128>}]} {
    %c0_i32 = arith.constant 0 : i32
    %0 = arith.cmpi eq, %arg2, %c0_i32 : i32
    %1 = arith.extui %0 : i1 to i32
    %c0_i32_0 = arith.constant 0 : i32
    %2 = arith.cmpi ne, %1, %c0_i32_0 : i32
    scf.if %2 {
      %cst_10 = arith.constant 0.000000e+00 : f32
      %12 = vector.broadcast %cst_10 : f32 to vector<16x128xf32>
      %c0_11 = arith.constant 0 : index
      %c0_12 = arith.constant 0 : index
      %13 = vector.load %arg7[%c0_11, %c0_12] : memref<16x128xf32, #tpu.memory_space<vmem>>, vector<16x128xf32>
      tpu.vector_store %arg7[%c0_11, %c0_12], %12 {strides = array<i32>} : memref<16x128xf32, #tpu.memory_space<vmem>>, vector<16x128xf32>,
    } else {
    }
    %c0 = arith.constant 0 : index
    %c0_1 = arith.constant 0 : index
    %3 = vector.load %arg7[%c0, %c0_1] : memref<16x128xf32, #tpu.memory_space<vmem>>, vector<16x128xf32>
    %c0_2 = arith.constant 0 : index
    %c0_3 = arith.constant 0 : index
    %4 = vector.load %arg3[%c0_2, %c0_3] : memref<16x128xf32, #tpu.memory_space<vmem>>, vector<16x128xf32>
    %c0_4 = arith.constant 0 : index
    %c0_5 = arith.constant 0 : index
    %5 = vector.load %arg4[%c0_4, %c0_5] : memref<128x128xf32, #tpu.memory_space<vmem>>, vector<128x128xf32>
    %cst = arith.constant dense<0.000000e+00> : vector<16x128xf32>
    %6 = tpu.matmul %4, %5, %cst {dimension_numbers = #tpu.dot_dimension_numbers<[1], [0], [0], [1], [0, 0, 1, 1], [], []>} : vector<16x128xf32>, vector<128x128xf32>, vector<16x128xf32> -> vector<16x128xf32>
    %7 = arith.addf %3, %6 : vector<16x128xf32>
    %c0_6 = arith.constant 0 : index
    %c0_7 = arith.constant 0 : index
    %8 = vector.load %arg7[%c0_6, %c0_7] : memref<16x128xf32, #tpu.memory_space<vmem>>, vector<16x128xf32>
    tpu.vector_store %arg7[%c0_6, %c0_7], %7 {strides = array<i32>} : memref<16x128xf32, #tpu.memory_space<vmem>>, vector<16x128xf32>,
    %c0_i32_8 = arith.constant 0 : i32
    %9 = arith.cmpi eq, %arg2, %c0_i32_8 : i32
    %10 = arith.extui %9 : i1 to i32
    %c0_i32_9 = arith.constant 0 : i32
    %11 = arith.cmpi ne, %10, %c0_i32_9 : i32
    scf.if %11 {
      %c0_10 = arith.constant 0 : index
      %c0_11 = arith.constant 0 : index
      %12 = vector.load %arg7[%c0_10, %c0_11] : memref<16x128xf32, #tpu.memory_space<vmem>>, vector<16x128xf32>
      %c0_12 = arith.constant 0 : index
      %c0_13 = arith.constant 0 : index
      %13 = vector.load %arg5[%c0_12, %c0_13] : memref<1x128xf32, #tpu.memory_space<vmem>>, vector<1x128xf32>
      %14 = vector.broadcast %13 : vector<1x128xf32> to vector<16x128xf32>
      %15 = arith.addf %12, %14 : vector<16x128xf32>
      %c0_14 = arith.constant 0 : index
      %c0_15 = arith.constant 0 : index
      %16 = vector.load %arg6[%c0_14, %c0_15] : memref<16x128xf32, #tpu.memory_space<vmem>>, vector<16x128xf32>
      tpu.vector_store %arg6[%c0_14, %c0_15], %15 {strides = array<i32>} : memref<16x128xf32, #tpu.memory_space<vmem>>, vector<16x128xf32>,
    } else {
    }
    return
  }
  func.func @transform_0(%arg0: i32, %arg1: i32, %arg2: i32) -> (i32, i32) {
    %c0_i32 = arith.constant 0 : i32
    return %arg0, %arg2 : i32, i32
  }
  func.func @transform_1(%arg0: i32, %arg1: i32, %arg2: i32) -> (i32, i32) {
    %c0_i32 = arith.constant 0 : i32
    return %arg2, %arg1 : i32, i32
  }
  func.func @transform_2(%arg0: i32, %arg1: i32, %arg2: i32) -> (i32, i32) {
    %c0_i32 = arith.constant 0 : i32
    %c0_i32_0 = arith.constant 0 : i32
    return %c0_i32, %arg1 : i32, i32
  }
  func.func @transform_3(%arg0: i32, %arg1: i32, %arg2: i32) -> (i32, i32) {
    %c0_i32 = arith.constant 0 : i32
    return %arg0, %arg1 : i32, i32
  }
}

module attributes {stable_mosaic.version = 11 : i64} {
  func.func @_rope_attn_kernel(%arg0: i32, %arg1: memref<1x8x384xf32, #tpu.memory_space<vmem>>, %arg2: memref<8x128xf32, #tpu.memory_space<vmem>>, %arg3: memref<8x128xf32, #tpu.memory_space<vmem>>, %arg4: memref<1x8x128xf32, #tpu.memory_space<vmem>>, %arg5: memref<1x4x8x8xf32, #tpu.memory_space<vmem>>) attributes {dimension_semantics = [#tpu.dimension_semantics<parallel>], iteration_bounds = array<i64: 2>, scalar_prefetch = 0 : i64, scratch_operands = 0 : i64, tpu.core_type = #tpu.core_type<tc>, window_params = [{transform_indices = @transform_0, window_bounds = array<i64: 1, 8, 384>}, {pipeline_mode = #tpu.pipeline_mode<synchronous>, transform_indices = @transform_1, window_bounds = array<i64: 8, 128>}, {pipeline_mode = #tpu.pipeline_mode<synchronous>, transform_indices = @transform_2, window_bounds = array<i64: 8, 128>}, {transform_indices = @transform_3, window_bounds = array<i64: 1, 8, 128>}, {transform_indices = @transform_4, window_bounds = array<i64: 1, 4, 8, 8>}]} {
    %c0 = arith.constant 0 : index
    %c0_0 = arith.constant 0 : index
    %c0_1 = arith.constant 0 : index
    %0 = vector.load %arg1[%c0, %c0_0, %c0_1] : memref<1x8x384xf32, #tpu.memory_space<vmem>>, vector<1x8x384xf32>
    %1 = vector.shape_cast %0 : vector<1x8x384xf32> to vector<8x384xf32>
    %2 = vector.extract_strided_slice %1 {offsets = [0, 0], sizes = [8, 128], strides = [1, 1]} : vector<8x384xf32> to vector<8x128xf32>
    %3 = vector.extract_strided_slice %1 {offsets = [0, 128], sizes = [8, 128], strides = [1, 1]} : vector<8x384xf32> to vector<8x128xf32>
    %4 = vector.extract_strided_slice %1 {offsets = [0, 256], sizes = [8, 128], strides = [1, 1]} : vector<8x384xf32> to vector<8x128xf32>
    %c0_2 = arith.constant 0 : index
    %c0_3 = arith.constant 0 : index
    %5 = vector.load %arg2[%c0_2, %c0_3] : memref<8x128xf32, #tpu.memory_space<vmem>>, vector<8x128xf32>
    %c0_4 = arith.constant 0 : index
    %c0_5 = arith.constant 0 : index
    %6 = vector.load %arg3[%c0_4, %c0_5] : memref<8x128xf32, #tpu.memory_space<vmem>>, vector<8x128xf32>
    %7 = tpu.iota {dimensions = array<i32: 1>} : vector<8x128xi32>
    %c1_i32 = arith.constant 1 : i32
    %8 = vector.broadcast %c1_i32 : i32 to vector<8x128xi32>
    %9 = arith.andi %7, %8 : vector<8x128xi32>
    %c0_i32 = arith.constant 0 : i32
    %10 = vector.broadcast %c0_i32 : i32 to vector<8x128xi32>
    %11 = arith.cmpi eq, %9, %10 : vector<8x128xi32>
    %c127_i32 = arith.constant 127 : i32
    %12 = tpu.dynamic_rotate %2 by %c127_i32 dim 1 : vector<8x128xf32>, i32 -> vector<8x128xf32>
    %c1_i32_6 = arith.constant 1 : i32
    %13 = tpu.dynamic_rotate %2 by %c1_i32_6 dim 1 : vector<8x128xf32>, i32 -> vector<8x128xf32>
    %cst = arith.constant 0.000000e+00 : f32
    %14 = vector.broadcast %cst : f32 to vector<8x128xf32>
    %15 = arith.subf %14, %12 : vector<8x128xf32>
    %16 = arith.select %11, %15, %13 : vector<8x128xi1>, vector<8x128xf32>
    %17 = arith.mulf %2, %5 : vector<8x128xf32>
    %18 = arith.mulf %16, %6 : vector<8x128xf32>
    %19 = arith.addf %17, %18 : vector<8x128xf32>
    %cst_7 = arith.constant 0.0883883461 : f32
    %20 = vector.broadcast %cst_7 : f32 to vector<8x128xf32>
    %21 = arith.mulf %19, %20 : vector<8x128xf32>
    %c127_i32_8 = arith.constant 127 : i32
    %22 = tpu.dynamic_rotate %3 by %c127_i32_8 dim 1 : vector<8x128xf32>, i32 -> vector<8x128xf32>
    %c1_i32_9 = arith.constant 1 : i32
    %23 = tpu.dynamic_rotate %3 by %c1_i32_9 dim 1 : vector<8x128xf32>, i32 -> vector<8x128xf32>
    %cst_10 = arith.constant 0.000000e+00 : f32
    %24 = vector.broadcast %cst_10 : f32 to vector<8x128xf32>
    %25 = arith.subf %24, %22 : vector<8x128xf32>
    %26 = arith.select %11, %25, %23 : vector<8x128xi1>, vector<8x128xf32>
    %27 = arith.mulf %3, %5 : vector<8x128xf32>
    %28 = arith.mulf %26, %6 : vector<8x128xf32>
    %29 = arith.addf %27, %28 : vector<8x128xf32>
    %30 = vector.extract_strided_slice %21 {offsets = [0, 0], sizes = [8, 32], strides = [1, 1]} : vector<8x128xf32> to vector<8x32xf32>
    %31 = vector.extract_strided_slice %29 {offsets = [0, 0], sizes = [8, 32], strides = [1, 1]} : vector<8x128xf32> to vector<8x32xf32>
    %32 = vector.extract_strided_slice %4 {offsets = [0, 0], sizes = [8, 32], strides = [1, 1]} : vector<8x128xf32> to vector<8x32xf32>
    %cst_11 = arith.constant dense<0.000000e+00> : vector<8x8xf32>
    %33 = tpu.matmul %30, %31, %cst_11 {dimension_numbers = #tpu.dot_dimension_numbers<[1], [1], [0], [0], [0, 0, 1, 0], [], []>} : vector<8x32xf32>, vector<8x32xf32>, vector<8x8xf32> -> vector<8x8xf32>
    %c0_12 = arith.constant 0 : index
    %c0_13 = arith.constant 0 : index
    %c0_14 = arith.constant 0 : index
    %c0_15 = arith.constant 0 : index
    %34 = vector.load %arg5[%c0_12, %c0_13, %c0_14, %c0_15] : memref<1x4x8x8xf32, #tpu.memory_space<vmem>>, vector<1x1x8x8xf32>
    %35 = vector.shape_cast %34 : vector<1x1x8x8xf32> to vector<8x8xf32>
    %36 = vector.shape_cast %33 : vector<8x8xf32> to vector<1x1x8x8xf32>
    tpu.vector_store %arg5[%c0_12, %c0_13, %c0_14, %c0_15], %36 {strides = array<i32>} : memref<1x4x8x8xf32, #tpu.memory_space<vmem>>, vector<1x1x8x8xf32>,
    %cst_16 = arith.constant dense<0xFF800000> : vector<8xf32>
    %37 = vector.multi_reduction <maximumf>, %33, %cst_16 [1] : vector<8x8xf32> to vector<8xf32>
    %38 = vector.shape_cast %37 : vector<8xf32> to vector<8x1xf32>
    %39 = vector.broadcast %38 : vector<8x1xf32> to vector<8x8xf32>
    %40 = arith.subf %33, %39 : vector<8x8xf32>
    %41 = math.exp %40 : vector<8x8xf32>
    %cst_17 = arith.constant dense<0.000000e+00> : vector<8xf32>
    %42 = vector.multi_reduction <add>, %41, %cst_17 [1] : vector<8x8xf32> to vector<8xf32>
    %43 = vector.shape_cast %42 : vector<8xf32> to vector<8x1xf32>
    %44 = tpu.reciprocal %43 {approx = true} : vector<8x1xf32> -> vector<8x1xf32>
    %45 = vector.broadcast %44 : vector<8x1xf32> to vector<8x8xf32>
    %46 = arith.mulf %41, %45 : vector<8x8xf32>
    %cst_18 = arith.constant dense<0.000000e+00> : vector<8x32xf32>
    %47 = tpu.matmul %46, %32, %cst_18 {dimension_numbers = #tpu.dot_dimension_numbers<[1], [0], [0], [1], [0, 0, 1, 1], [], []>} : vector<8x8xf32>, vector<8x32xf32>, vector<8x32xf32> -> vector<8x32xf32>
    %48 = vector.extract_strided_slice %21 {offsets = [0, 32], sizes = [8, 32], strides = [1, 1]} : vector<8x128xf32> to vector<8x32xf32>
    %49 = vector.extract_strided_slice %29 {offsets = [0, 32], sizes = [8, 32], strides = [1, 1]} : vector<8x128xf32> to vector<8x32xf32>
    %50 = vector.extract_strided_slice %4 {offsets = [0, 32], sizes = [8, 32], strides = [1, 1]} : vector<8x128xf32> to vector<8x32xf32>
    %cst_19 = arith.constant dense<0.000000e+00> : vector<8x8xf32>
    %51 = tpu.matmul %48, %49, %cst_19 {dimension_numbers = #tpu.dot_dimension_numbers<[1], [1], [0], [0], [0, 0, 1, 0], [], []>} : vector<8x32xf32>, vector<8x32xf32>, vector<8x8xf32> -> vector<8x8xf32>
    %c0_20 = arith.constant 0 : index
    %c1 = arith.constant 1 : index
    %c0_21 = arith.constant 0 : index
    %c0_22 = arith.constant 0 : index
    %52 = vector.load %arg5[%c0_20, %c1, %c0_21, %c0_22] : memref<1x4x8x8xf32, #tpu.memory_space<vmem>>, vector<1x1x8x8xf32>
    %53 = vector.shape_cast %52 : vector<1x1x8x8xf32> to vector<8x8xf32>
    %54 = vector.shape_cast %51 : vector<8x8xf32> to vector<1x1x8x8xf32>
    tpu.vector_store %arg5[%c0_20, %c1, %c0_21, %c0_22], %54 {strides = array<i32>} : memref<1x4x8x8xf32, #tpu.memory_space<vmem>>, vector<1x1x8x8xf32>,
    %cst_23 = arith.constant dense<0xFF800000> : vector<8xf32>
    %55 = vector.multi_reduction <maximumf>, %51, %cst_23 [1] : vector<8x8xf32> to vector<8xf32>
    %56 = vector.shape_cast %55 : vector<8xf32> to vector<8x1xf32>
    %57 = vector.broadcast %56 : vector<8x1xf32> to vector<8x8xf32>
    %58 = arith.subf %51, %57 : vector<8x8xf32>
    %59 = math.exp %58 : vector<8x8xf32>
    %cst_24 = arith.constant dense<0.000000e+00> : vector<8xf32>
    %60 = vector.multi_reduction <add>, %59, %cst_24 [1] : vector<8x8xf32> to vector<8xf32>
    %61 = vector.shape_cast %60 : vector<8xf32> to vector<8x1xf32>
    %62 = tpu.reciprocal %61 {approx = true} : vector<8x1xf32> -> vector<8x1xf32>
    %63 = vector.broadcast %62 : vector<8x1xf32> to vector<8x8xf32>
    %64 = arith.mulf %59, %63 : vector<8x8xf32>
    %cst_25 = arith.constant dense<0.000000e+00> : vector<8x32xf32>
    %65 = tpu.matmul %64, %50, %cst_25 {dimension_numbers = #tpu.dot_dimension_numbers<[1], [0], [0], [1], [0, 0, 1, 1], [], []>} : vector<8x8xf32>, vector<8x32xf32>, vector<8x32xf32> -> vector<8x32xf32>
    %66 = vector.extract_strided_slice %21 {offsets = [0, 64], sizes = [8, 32], strides = [1, 1]} : vector<8x128xf32> to vector<8x32xf32>
    %67 = vector.extract_strided_slice %29 {offsets = [0, 64], sizes = [8, 32], strides = [1, 1]} : vector<8x128xf32> to vector<8x32xf32>
    %68 = vector.extract_strided_slice %4 {offsets = [0, 64], sizes = [8, 32], strides = [1, 1]} : vector<8x128xf32> to vector<8x32xf32>
    %cst_26 = arith.constant dense<0.000000e+00> : vector<8x8xf32>
    %69 = tpu.matmul %66, %67, %cst_26 {dimension_numbers = #tpu.dot_dimension_numbers<[1], [1], [0], [0], [0, 0, 1, 0], [], []>} : vector<8x32xf32>, vector<8x32xf32>, vector<8x8xf32> -> vector<8x8xf32>
    %c0_27 = arith.constant 0 : index
    %c2 = arith.constant 2 : index
    %c0_28 = arith.constant 0 : index
    %c0_29 = arith.constant 0 : index
    %70 = vector.load %arg5[%c0_27, %c2, %c0_28, %c0_29] : memref<1x4x8x8xf32, #tpu.memory_space<vmem>>, vector<1x1x8x8xf32>
    %71 = vector.shape_cast %70 : vector<1x1x8x8xf32> to vector<8x8xf32>
    %72 = vector.shape_cast %69 : vector<8x8xf32> to vector<1x1x8x8xf32>
    tpu.vector_store %arg5[%c0_27, %c2, %c0_28, %c0_29], %72 {strides = array<i32>} : memref<1x4x8x8xf32, #tpu.memory_space<vmem>>, vector<1x1x8x8xf32>,
    %cst_30 = arith.constant dense<0xFF800000> : vector<8xf32>
    %73 = vector.multi_reduction <maximumf>, %69, %cst_30 [1] : vector<8x8xf32> to vector<8xf32>
    %74 = vector.shape_cast %73 : vector<8xf32> to vector<8x1xf32>
    %75 = vector.broadcast %74 : vector<8x1xf32> to vector<8x8xf32>
    %76 = arith.subf %69, %75 : vector<8x8xf32>
    %77 = math.exp %76 : vector<8x8xf32>
    %cst_31 = arith.constant dense<0.000000e+00> : vector<8xf32>
    %78 = vector.multi_reduction <add>, %77, %cst_31 [1] : vector<8x8xf32> to vector<8xf32>
    %79 = vector.shape_cast %78 : vector<8xf32> to vector<8x1xf32>
    %80 = tpu.reciprocal %79 {approx = true} : vector<8x1xf32> -> vector<8x1xf32>
    %81 = vector.broadcast %80 : vector<8x1xf32> to vector<8x8xf32>
    %82 = arith.mulf %77, %81 : vector<8x8xf32>
    %cst_32 = arith.constant dense<0.000000e+00> : vector<8x32xf32>
    %83 = tpu.matmul %82, %68, %cst_32 {dimension_numbers = #tpu.dot_dimension_numbers<[1], [0], [0], [1], [0, 0, 1, 1], [], []>} : vector<8x8xf32>, vector<8x32xf32>, vector<8x32xf32> -> vector<8x32xf32>
    %84 = vector.extract_strided_slice %21 {offsets = [0, 96], sizes = [8, 32], strides = [1, 1]} : vector<8x128xf32> to vector<8x32xf32>
    %85 = vector.extract_strided_slice %29 {offsets = [0, 96], sizes = [8, 32], strides = [1, 1]} : vector<8x128xf32> to vector<8x32xf32>
    %86 = vector.extract_strided_slice %4 {offsets = [0, 96], sizes = [8, 32], strides = [1, 1]} : vector<8x128xf32> to vector<8x32xf32>
    %cst_33 = arith.constant dense<0.000000e+00> : vector<8x8xf32>
    %87 = tpu.matmul %84, %85, %cst_33 {dimension_numbers = #tpu.dot_dimension_numbers<[1], [1], [0], [0], [0, 0, 1, 0], [], []>} : vector<8x32xf32>, vector<8x32xf32>, vector<8x8xf32> -> vector<8x8xf32>
    %c0_34 = arith.constant 0 : index
    %c3 = arith.constant 3 : index
    %c0_35 = arith.constant 0 : index
    %c0_36 = arith.constant 0 : index
    %88 = vector.load %arg5[%c0_34, %c3, %c0_35, %c0_36] : memref<1x4x8x8xf32, #tpu.memory_space<vmem>>, vector<1x1x8x8xf32>
    %89 = vector.shape_cast %88 : vector<1x1x8x8xf32> to vector<8x8xf32>
    %90 = vector.shape_cast %87 : vector<8x8xf32> to vector<1x1x8x8xf32>
    tpu.vector_store %arg5[%c0_34, %c3, %c0_35, %c0_36], %90 {strides = array<i32>} : memref<1x4x8x8xf32, #tpu.memory_space<vmem>>, vector<1x1x8x8xf32>,
    %cst_37 = arith.constant dense<0xFF800000> : vector<8xf32>
    %91 = vector.multi_reduction <maximumf>, %87, %cst_37 [1] : vector<8x8xf32> to vector<8xf32>
    %92 = vector.shape_cast %91 : vector<8xf32> to vector<8x1xf32>
    %93 = vector.broadcast %92 : vector<8x1xf32> to vector<8x8xf32>
    %94 = arith.subf %87, %93 : vector<8x8xf32>
    %95 = math.exp %94 : vector<8x8xf32>
    %cst_38 = arith.constant dense<0.000000e+00> : vector<8xf32>
    %96 = vector.multi_reduction <add>, %95, %cst_38 [1] : vector<8x8xf32> to vector<8xf32>
    %97 = vector.shape_cast %96 : vector<8xf32> to vector<8x1xf32>
    %98 = tpu.reciprocal %97 {approx = true} : vector<8x1xf32> -> vector<8x1xf32>
    %99 = vector.broadcast %98 : vector<8x1xf32> to vector<8x8xf32>
    %100 = arith.mulf %95, %99 : vector<8x8xf32>
    %cst_39 = arith.constant dense<0.000000e+00> : vector<8x32xf32>
    %101 = tpu.matmul %100, %86, %cst_39 {dimension_numbers = #tpu.dot_dimension_numbers<[1], [0], [0], [1], [0, 0, 1, 1], [], []>} : vector<8x8xf32>, vector<8x32xf32>, vector<8x32xf32> -> vector<8x32xf32>
    %102 = tpu.concatenate %47, %65, %83, %101 in 1 : vector<8x32xf32>, vector<8x32xf32>, vector<8x32xf32>, vector<8x32xf32> -> vector<8x128xf32>
    %c0_40 = arith.constant 0 : index
    %c0_41 = arith.constant 0 : index
    %c0_42 = arith.constant 0 : index
    %103 = vector.load %arg4[%c0_40, %c0_41, %c0_42] : memref<1x8x128xf32, #tpu.memory_space<vmem>>, vector<1x8x128xf32>
    %104 = vector.shape_cast %103 : vector<1x8x128xf32> to vector<8x128xf32>
    %105 = vector.shape_cast %102 : vector<8x128xf32> to vector<1x8x128xf32>
    tpu.vector_store %arg4[%c0_40, %c0_41, %c0_42], %105 {strides = array<i32>} : memref<1x8x128xf32, #tpu.memory_space<vmem>>, vector<1x8x128xf32>,
    return
  }
  func.func @transform_0(%arg0: i32) -> (i32, i32, i32) {
    %c0_i32 = arith.constant 0 : i32
    %c0_i32_0 = arith.constant 0 : i32
    %c0_i32_1 = arith.constant 0 : i32
    return %arg0, %c0_i32, %c0_i32_0 : i32, i32, i32
  }
  func.func @transform_1(%arg0: i32) -> (i32, i32) {
    %c0_i32 = arith.constant 0 : i32
    %c0_i32_0 = arith.constant 0 : i32
    %c0_i32_1 = arith.constant 0 : i32
    return %c0_i32, %c0_i32_0 : i32, i32
  }
  func.func @transform_2(%arg0: i32) -> (i32, i32) {
    %c0_i32 = arith.constant 0 : i32
    %c0_i32_0 = arith.constant 0 : i32
    %c0_i32_1 = arith.constant 0 : i32
    return %c0_i32, %c0_i32_0 : i32, i32
  }
  func.func @transform_3(%arg0: i32) -> (i32, i32, i32) {
    %c0_i32 = arith.constant 0 : i32
    %c0_i32_0 = arith.constant 0 : i32
    %c0_i32_1 = arith.constant 0 : i32
    return %arg0, %c0_i32, %c0_i32_0 : i32, i32, i32
  }
  func.func @transform_4(%arg0: i32) -> (i32, i32, i32, i32) {
    %c0_i32 = arith.constant 0 : i32
    %c0_i32_0 = arith.constant 0 : i32
    %c0_i32_1 = arith.constant 0 : i32
    %c0_i32_2 = arith.constant 0 : i32
    return %arg0, %c0_i32, %c0_i32_0, %c0_i32_1 : i32, i32, i32, i32
  }
}

</mosaic_0001>

<bundles_post_ra>
// kernel: tile.11
= control target key start
LH: loop header
LB: loop body
LE: loop exit
PB: predicated region body
PF: predicated region fallthrough
CT: control target
= control target key end

     0   :  { %vm42_vm0 = vcmask 1047556   ;;  %vm44_vm1 = vcmask 261120   ;;  %s93_s22 = smov 32   ;;  %s94_s25 = smov 64   ;;  %vm54_vm2 = vcmask 1048320   ;;  %vm64_vm3 = vcmask 785920   ;;  %s146_s0 = inlined_call_operand.vmem [shape: f32[8,4,32], index: 0, kind: input, shape index: {}]   ;;  %s147_s1 = inlined_call_operand.vmem [shape: f32[8,128], index: 1, kind: output, shape index: {}]  }
   0x1   :  { %v82_v0 = vld [vmem:[%s146_s0 + $0x1c] sm:$0xf]  ;;  %v83_v1 = vld [vmem:[%s146_s0 + $0x18] sm:$0xf]  ;;  %v84_v2 = vld [vmem:[%s146_s0 + $0x14] sm:$0xf] }
   0x2   :  { %8 = vst [vmem:[#allocation0 + $0x38] sm:$0xf] %v82_v0  ;;  %13 = vst [vmem:[#allocation0 + $0x30] sm:$0xf] %v83_v1  ;;  %v85_v3 = vld [vmem:[%s146_s0 + $0x10] sm:$0xf] }
   0x3   :  { %18 = vst [vmem:[#allocation0 + $0x28] sm:$0xf] %v84_v2  ;;  %v86_v4 = vld [vmem:[%s146_s0 + $0xc] sm:$0xf]  ;;  %v87_v5 = vld [vmem:[%s146_s0 + $0x8] sm:$0xf] }
   0x4   :  { %23 = vst [vmem:[#allocation0 + $0x20] sm:$0xf] %v85_v3  ;;  %28 = vst [vmem:[#allocation0 + $0x18] sm:$0xf] %v86_v4  ;;  %v88_v6 = vld [vmem:[%s146_s0 + $0x4] sm:$0xf] }
   0x5   :  { %33 = vst [vmem:[#allocation0 + $0x10] sm:$0xf] %v87_v5  ;;  %v38_v7 = vld [vmem:[%s146_s0] sm:$0xf]  ;;  %37 = vst [vmem:[#allocation0 + $0x8] sm:$0xf] %v88_v6 }
   0x6   :  { %39 = vst [vmem:[#allocation0] sm:$0xf] %v38_v7  ;;  %s92_s0 = smov 96   ;;  %vm74_vm4 = vcmask 523520  }
   0xb   :  { %v49_v8 = vld [vmem:[#allocation0 + $0x3] ss:$8 sm:$0xf0]   ;;  %v59_v9 = vld [vmem:[#allocation0 + $0x2] ss:$8 sm:$0xf0]  }
   0xc   :  { %v69_v14 = vld [vmem:[#allocation0 + $0x1] ss:$8 sm:$0xf0]   ;;  %v41_v17 = vld [vmem:[#allocation0] ss:$8 sm:$0xf0]  }
   0xd   :  { %v47_v10 = vld [vmem:[#allocation0 + $0x3] ss:$8 sm:$0xf]   ;;  %v57_v11 = vld [vmem:[#allocation0 + $0x2] ss:$8 sm:$0xf]  }
   0xe   :  { %v51_v12 = vsel %vm42_vm0, %v49_v8, %v47_v10  ;;  %v67_v13 = vld [vmem:[#allocation0 + $0x1] ss:$8 sm:$0xf]   ;;  %v40_v16 = vld [vmem:[#allocation0] ss:$8 sm:$0xf]   ;;  %v61_v18 = vsel %vm42_vm0, %v59_v9, %v57_v11 }
   0xf   :  { %52 = vrot.lane.b32.xlu0 %v51_v12, %s92_s0  ;;  %v71_v15 = vsel %vm42_vm0, %v69_v14, %v67_v13  ;;  %v43_v19 = vsel %vm42_vm0, %v41_v17, %v40_v16 }
  0x10   :  { %72 = vrot.lane.b32.xlu1 %v71_v15, %s93_s22  ;;  %45 = vst.msk [vmem:[%s147_s1] sm:$0xff] %vm44_vm1, %v43_v19  }
  0x13   :  { %62 = vrot.lane.b32.xlu0 %v61_v18, %s94_s25 }
  0x81   :  { %v53_v20 = vpop.permute.xlu0 %52  }
  0x82   :  { %55 = vst.msk [vmem:[%s147_s1] sm:$0xff] %vm54_vm2, %v53_v20   ;;  %v73_v21 = vpop.permute.xlu1 %72  }
  0x85   :  { %v63_v22 = vpop.permute.xlu0 %62  }
  0x86   :  { %65 = vst.msk [vmem:[%s147_s1] sm:$0xff] %vm64_vm3, %v63_v22  }
  0x87   :  { %75 = vst.msk [vmem:[%s147_s1] sm:$0xff] %vm74_vm4, %v73_v21  }

// kernel: multi_heads_attention.2
= control target key start
LH: loop header
LB: loop body
LE: loop exit
PB: predicated region body
PF: predicated region fallthrough
CT: control target
= control target key end

     0   :  { %s802_s12 = smov 0   ;;  %s804_s13 = smov 0   ;;  %s925_s0 = inlined_call_operand.vmem [shape: f32[16,128], index: 0, kind: input, shape index: {}]   ;;  %s926_s1 = inlined_call_operand.vmem [shape: f32[128,384], index: 1, kind: input, shape index: {}]   ;;  %s927_s2 = inlined_call_operand.vmem [shape: f32[1,384], index: 2, kind: input, shape index: {}]   ;;  %s928_s3 = inlined_call_operand.vmem [shape: f32[16,384], index: 3, kind: output, shape index: {}]  }
   0x1   :  { %s806_s14 = smov 0   ;;  %s808_s15 = smov 0  }
   0x2   :  { %s810_s16 = smov 0  }
   0x3 LB: > { %s28_s17 = sadd.s32 1, %s776_s15  ;;  %s602_s18 = sadd.s32 4294967295, %s780_s16   ;;  %s780_s16 = sphi %s810_s16, %s13_s16   ;;  %s776_s15 = sphi %s808_s15, %s933_s15   ;;  %s772_s14 = sphi %s806_s14, %s932_s14   ;;  %s768_s13 = sphi %s804_s13, %s931_s13   ;;  %s764_s12 = sphi %s802_s12, %s930_s12  }
   0x4   : > { %p30_p0 = scmp.ge.s32.totalorder %s28_s17, 3  ;;  %p76_p1 = scmp.ne.s32.totalorder %s768_s13, %s764_s12 }
   0x5   : > { %p77_p2 = scmp.eq.s32.totalorder %s780_s16, 0  ;;  %p134_p4 = scmp.eq.s32.totalorder %s602_s18, 2 }
   0x6   : > { %s935_s17 = smov (%p30_p0, %s28_s17), 0  ;;  %s69_s20 = sadd.s32 1, %s768_s13 }
   0x7   : > { %p78_p3 = por %p77_p2, %p76_p1  ;;  %s65_s19 = ssub.s32 %s776_s15, %s935_s17 }
   0x8   : > { %p67_p5 = scmp.eq.s32.totalorder %s65_s19, 0  ;;  %p837_p6 = por %p134_p4, %p76_p1 }
   0x9   : > { %p606_p7 = scmp.ge.s32.totalorder %s780_s16, 3 }
   0xa   : > { %s842_s22 = scalar_select %p67_p5, %s768_s13, %s69_s20  }
   0xb   : > { %168 = sbr.rel (%p606_p7) target bundleno = 30 (0x1e), region = 20 }
  0x12   : > { %171 = sbr.rel (!%p78_p3) target bundleno = 30 (0x1e), region = 24  ;;  %s173_s23 = sand.u32 (%p78_p3), 1, %s768_s13  }
  0x13   : > { %s608_s24 = sshll.u32 (%p78_p3), %s776_s15, 3  ;;  %s607_s25 = sshll.u32 (%p78_p3), %s173_s23, 7 }
  0x14   : > { %s850_s28 = scalar_lea.vmem (%p78_p3), %s926_s1, %s608_s24  ;;  %s175_s29 = scalar_lea.vmem (%p78_p3), [#allocation3], %s607_s25 }
  0x15   : > { %v238_v0 = vld [vmem:[%s850_s28] sm:$0xff] (%p78_p3)  ;;  %v240_v1 = vld [vmem:[%s850_s28 + $0x18] sm:$0xff] (%p78_p3)  ;;  %v242_v2 = vld [vmem:[%s850_s28 + $0x30] sm:$0xff] (%p78_p3) }
  0x16   : > { %239 = vst [vmem:[%s175_s29] sm:$0xff] (%p78_p3), %v238_v0  ;;  %241 = vst [vmem:[%s175_s29 + $0x8] sm:$0xff] (%p78_p3), %v240_v1  ;;  %v244_v3 = vld [vmem:[%s850_s28 + $0x48] sm:$0xff] (%p78_p3)  ;;  %v246_v4 = vld [vmem:[%s850_s28 + $0x60] sm:$0xff] (%p78_p3) }
  0x17   : > { %243 = vst [vmem:[%s175_s29 + $0x10] sm:$0xff] (%p78_p3), %v242_v2  ;;  %v248_v5 = vld [vmem:[%s850_s28 + $0x78] sm:$0xff] (%p78_p3)  ;;  %245 = vst [vmem:[%s175_s29 + $0x18] sm:$0xff] (%p78_p3), %v244_v3  ;;  %v250_v6 = vld [vmem:[%s850_s28 + $0x90] sm:$0xff] (%p78_p3) }
  0x18   : > { %247 = vst [vmem:[%s175_s29 + $0x20] sm:$0xff] (%p78_p3), %v246_v4  ;;  %249 = vst [vmem:[%s175_s29 + $0x28] sm:$0xff] (%p78_p3), %v248_v5  ;;  %v252_v7 = vld [vmem:[%s850_s28 + $0xa8] sm:$0xff] (%p78_p3)  ;;  %v254_v8 = vld [vmem:[%s850_s28 + $0xc0] sm:$0xff] (%p78_p3) }
  0x19   : > { %251 = vst [vmem:[%s175_s29 + $0x30] sm:$0xff] %v250_v6  ;;  %253 = vst [vmem:[%s175_s29 + $0x38] sm:$0xff] %v252_v7  ;;  %v256_v9 = vld [vmem:[%s850_s28 + $0xd8] sm:$0xff]  ;;  %v258_v10 = vld [vmem:[%s850_s28 + $0xf0] sm:$0xff] }
  0x1a   : > { %255 = vst [vmem:[%s175_s29 + $0x40] sm:$0xff] %v254_v8  ;;  %v260_v11 = vld [vmem:[%s850_s28 + $0x108] sm:$0xff]  ;;  %257 = vst [vmem:[%s175_s29 + $0x48] sm:$0xff] %v256_v9  ;;  %v262_v12 = vld [vmem:[%s850_s28 + $0x120] sm:$0xff] }
  0x1b   : > { %259 = vst [vmem:[%s175_s29 + $0x50] sm:$0xff] %v258_v10  ;;  %261 = vst [vmem:[%s175_s29 + $0x58] sm:$0xff] %v260_v11  ;;  %v264_v13 = vld [vmem:[%s850_s28 + $0x138] sm:$0xff]  ;;  %v266_v14 = vld [vmem:[%s850_s28 + $0x150] sm:$0xff] }
  0x1c   : > { %263 = vst [vmem:[%s175_s29 + $0x60] sm:$0xff] %v262_v12  ;;  %265 = vst [vmem:[%s175_s29 + $0x68] sm:$0xff] %v264_v13  ;;  %v268_v15 = vld [vmem:[%s850_s28 + $0x168] sm:$0xff] }
  0x1d   : > { %267 = vst [vmem:[%s175_s29 + $0x70] sm:$0xff] %v266_v14  ;;  %269 = vst [vmem:[%s175_s29 + $0x78] sm:$0xff] %v268_v15 }
  0x1e PF: > { %p609_p8 = scmp.ge.s32.totalorder %s780_s16, 1  ;;  %p280_p9 = scmp.lt.s32.totalorder %s780_s16, 4 }
  0x20   : > { %p281_p10 = pnand %p609_p8, %p280_p9 }
  0x21   : > { %s287_s30 = sand.u32 (!%p281_p10), 1, %s764_s12   ;;  %v342_v16 = vld [vmem:[%s925_s0] sm:$0xff] (!%p281_p10)  ;;  %v343_v41 = vld [vmem:[%s925_s0 + $0x8] sm:$0xff] (!%p281_p10)  ;;  %p330_p11 = scmp.lt.s32.totalorder (!%p281_p10), %s772_s14, 2 }
  0x22   : > { %284 = sbr.rel (%p281_p10) target bundleno = 295 (0x127), region = 66  ;;  %s610_s6 = sshll.u32 (!%p281_p10), %s287_s30, 7  ;;  %667 = vmatprep.mubr.f32.mxu0 (!%p281_p10), %v342_v16 }
  0x23   : > { %s876_s7 = scalar_lea.vmem (!%p281_p10), [#allocation3], %s610_s6  ;;  %s611_s20 = sshll.u32 (!%p281_p10), %s287_s30, 4 }
  0x24   : > { %v344_v17 = vld [vmem:[%s876_s7] sm:$0xff] (!%p281_p10)  ;;  %v345_v18 = vld [vmem:[%s876_s7 + $0x8] sm:$0xff] (!%p281_p10)  ;;  %v346_v19 = vld [vmem:[%s876_s7 + $0x10] sm:$0xff] (!%p281_p10)  ;;  %s319_s23 = scalar_lea.vmem (!%p281_p10), [#allocation4], %s611_s20 }
  0x25   : > { %v670_v20 = vpack.c.bf16 (!%p281_p10), %v345_v18, %v344_v17  ;;  %v347_v21 = vld [vmem:[%s876_s7 + $0x18] sm:$0xff] (!%p281_p10)  ;;  %v348_v23 = vld [vmem:[%s876_s7 + $0x20] sm:$0xff] (!%p281_p10)  ;;  %v349_v24 = vld [vmem:[%s876_s7 + $0x28] sm:$0xff] (!%p281_p10) }
  0x26   : > { %v674_v22 = vpack.c.bf16 (!%p281_p10), %v347_v21, %v346_v19  ;;  %v678_v25 = vpack.c.bf16 (!%p281_p10), %v349_v24, %v348_v23  ;;  %v350_v26 = vld [vmem:[%s876_s7 + $0x30] sm:$0xff] (!%p281_p10)  ;;  %v351_v27 = vld [vmem:[%s876_s7 + $0x38] sm:$0xff] (!%p281_p10)  ;;  %v352_v29 = vld [vmem:[%s876_s7 + $0x40] sm:$0xff] (!%p281_p10) }
  0x27   : > { %671 = vmatprep.subr.bf16.mxu0 (!%p281_p10), %v670_v20  ;;  %v682_v28 = vpack.c.bf16 (!%p281_p10), %v351_v27, %v350_v26  ;;  %v353_v30 = vld [vmem:[%s876_s7 + $0x48] sm:$0xff] (!%p281_p10)  ;;  %v354_v32 = vld [vmem:[%s876_s7 + $0x50] sm:$0xff] (!%p281_p10)  ;;  %v355_v33 = vld [vmem:[%s876_s7 + $0x58] sm:$0xff] (!%p281_p10) }
  0x28   : > { %673 = vmatpush3.bf16.msra.mxu0 (!%p281_p10), %v670_v20  ;;  %v686_v31 = vpack.c.bf16 (!%p281_p10), %v353_v30, %v352_v29  ;;  %v690_v34 = vpack.c.bf16 (!%p281_p10), %v355_v33, %v354_v32  ;;  %v356_v35 = vld [vmem:[%s876_s7 + $0x60] sm:$0xff] (!%p281_p10)  ;;  %v357_v36 = vld [vmem:[%s876_s7 + $0x68] sm:$0xff] (!%p281_p10)  ;;  %v358_v38 = vld [vmem:[%s876_s7 + $0x70] sm:$0xff] (!%p281_p10) }
  0x29   : > { %675 = vmatprep.subr.bf16.mxu0 %v674_v22  ;;  %v694_v37 = vpack.c.bf16 %v357_v36, %v356_v35  ;;  %v359_v39 = vld [vmem:[%s876_s7 + $0x78] sm:$0xff]  ;;  %s331_s10 = scalar_select %p330_p11, %s772_s14, 2 }
  0x2a   : > { %v698_v40 = vpack.c.bf16 %v359_v39, %v358_v38  ;;  %s614_s24 = sshll.u32 (%p837_p6), %s772_s14, 3 }
  0x2b   : > { %s332_s19 = scalar_lea.vmem %s927_s2, %s331_s10  ;;  %s466_s12 = scalar_lea.vmem (%p837_p6), %s928_s3, %s614_s24 }
  0x2c   : > { %677 = vmatpush3.bf16.msra.mxu0 %v674_v22  ;;  %v612_v42 = vld [vmem:[%s332_s19] ss:$0 sm:$0xff] }
  0x2d   : > { %679 = vmatprep.subr.bf16.mxu0 %v678_v25 }
  0x30   : > { %681 = vmatpush3.bf16.msra.mxu0 %v678_v25 }
  0x31   : > { %683 = vmatprep.subr.bf16.mxu0 %v682_v28 }
  0x34   : > { %685 = vmatpush3.bf16.msra.mxu0 %v682_v28 }
  0x35   : > { %687 = vmatprep.subr.bf16.mxu0 %v686_v31 }
  0x38   : > { %689 = vmatpush3.bf16.msra.mxu0 %v686_v31 }
  0x39   : > { %691 = vmatprep.subr.bf16.mxu0 %v690_v34 }
  0x3c   : > { %693 = vmatpush3.bf16.msra.mxu0 %v690_v34 }
  0x3d   : > { %695 = vmatprep.subr.bf16.mxu0 %v694_v37 }
  0x40   : > { %697 = vmatpush3.bf16.msra.mxu0 %v694_v37 }
  0x41   : > { %699 = vmatprep.subr.bf16.mxu0 %v698_v40 }
  0x44   : > { %701 = vmatpush3.bf16.msra.mxu0 %v698_v40 }
  0x47   : > { %668 = vmatmul.mubr.f32.vlgmr.msra.gmra.mrb[0].mxu0 %v343_v41 }
 0x118   : > { %461 = sbr.rel (!%p837_p6) target bundleno = 295 (0x127), region = 82 }
 0x11a   : > { %v669_v43 = vpop.f32.mrb[0].mxu0 }
 0x11b   : > { %v452_v44 = vadd.f32 %v669_v43, %v612_v42  ;;  %v426_v45 = vpop.f32.mrb[1].mxu0 }
 0x11c   : > { %v451_v46 = vadd.f32 %v612_v42, %v426_v45 }
 0x11d   : > { %454 = vst [vmem:[%s319_s23 + $0x8] sm:$0xff] %v452_v44 }
 0x11e   : > { %453 = vst [vmem:[%s319_s23] sm:$0xff] %v451_v46 }
 0x124   : > { %v498_v48 = vld [vmem:[%s319_s23 + $0x8] sm:$0xff] }
 0x125   : > { %v496_v47 = vld [vmem:[%s319_s23] sm:$0xff]  ;;  %499 = vst [vmem:[%s466_s12 + $0x18] sm:$0xff] %v498_v48 }
 0x126   : > { %497 = vst [vmem:[%s466_s12] sm:$0xff] %v496_v47 }
 0x127 PF: > { %s13_s16 = sadd.s32 1, %s780_s16   ;;  %s930_s12 = smov %s768_s13 }
 0x128   : > { %p10_p12 = scmp.ge.s32.totalorder %s13_s16, 5   ;;  %s931_s13 = smov %s842_s22 }
 0x129   : > { %s932_s14 = smov %s776_s15  ;;  %s933_s15 = smov %s935_s17 }
 0x12a   :  { %12 = sbr.rel (!%p10_p12) target bundleno = 3 (0x3), region = 157 }

// kernel: multi_heads_attention.3
= control target key start
LH: loop header
LB: loop body
LE: loop exit
PB: predicated region body
PF: predicated region fallthrough
CT: control target
= control target key end

     0   :  { %10 = vsyncpa [#allocation3], 0  ;;  %s1557_s0 = inlined_call_operand.vmem [shape: f32[2,8,384], index: 0, kind: input, shape index: {}]   ;;  %s1558_s1 = inlined_call_operand.vmem [shape: f32[8,128], index: 1, kind: input, shape index: {}]   ;;  %s1559_s2 = inlined_call_operand.vmem [shape: f32[8,128], index: 2, kind: input, shape index: {}]   ;;  %s1560_s3 = inlined_call_operand.hbm [shape: f32[2,8,128], index: 3, kind: output, shape index: {0}]   ;;  %s1561_s4 = inlined_call_operand.hbm [shape: f32[2,4,8,8], index: 4, kind: output, shape index: {1}]  }
   0x1   :  { %12 = vsyncpa [#allocation3 + $0x1], 0 }
   0x2   :  { %13 = vsyncpa [#allocation5], 0 }
   0x3   :  { %15 = vsyncpa [#allocation5 + $0x1], 0  ;;  %s1332_s15 = smov 0   ;;  %s1334_s16 = smov 0  }
   0x4   :  { %s1336_s17 = smov 0   ;;  %s1338_s18 = smov 0  }
   0x5 LB: > { %s1353_s19 = sadd.s32 4294967295, %s1294_s18   ;;  %s1044_s20 = sadd.s32 4294967294, %s1294_s18   ;;  %s1294_s18 = sphi %s1338_s18, %s1567_s18   ;;  %s1290_s17 = sphi %s1336_s17, %s1566_s17   ;;  %s1286_s16 = sphi %s1334_s16, %s1565_s16   ;;  %s1282_s15 = sphi %s1332_s15, %s1564_s15  }
   0x6   : > { %s1357_s21 = sadd.s32 1, %s1294_s18   ;;  %s96_s22 = sadd.s32 1, %s1290_s17 }
   0x7   : > { %s93_s23 = ssub.s32 %s1294_s18, %s1357_s21  ;;  %p106_p0 = scmp.ne.s32.totalorder %s1290_s17, %s1286_s16 }
   0x8   : > { %p94_p1 = scmp.eq.s32.totalorder %s93_s23, 0  ;;  %p107_p2 = scmp.eq.s32.totalorder %s1353_s19, 1 }
   0x9   : > { %p112_p3 = scmp.ne.s32.totalorder %s1286_s16, %s1282_s15  ;;  %p113_p4 = scmp.eq.s32.totalorder %s1044_s20, 1 }
   0xa   : > { %s1368_s24 = scalar_select %p94_p1, %s1290_s17, %s96_s22  }
   0xb   : > { %p1370_p5 = por %p107_p2, %p106_p0  ;;  %p1374_p6 = por %p113_p4, %p112_p3 }
   0xc   : > { %p1047_p7 = scmp.ge.s32.totalorder %s1294_s18, 1  ;;  %p171_p8 = scmp.lt.s32.totalorder %s1294_s18, 3 }
   0xe   : > { %p172_p9 = pnand %p1047_p7, %p171_p8 }
   0xf   : > { %p202_p10 = scmp.lt.s32.totalorder (!%p172_p9), %s1353_s19, 1  ;;  %v1296_v0 = vmov (!%p172_p9), 0.0   ;;  %vm1297_vm0 = vmmov (!%p172_p9), 0   ;;  %s1298_s6 = smov (!%p172_p9), 127   ;;  %v212_v3 = vlaneseq (!%p172_p9)  ;;  %v210_v6 = vld [vmem:[%s1558_s1] sm:$0xff] (!%p172_p9)  ;;  %vm235_vm2 = vcmask (!%p172_p9), 261120  }
  0x10   : > { %175 = sbr.rel (%p172_p9) target bundleno = 1571 (0x623), region = 32  ;;  %1090 = vmatprep.subr.mxu0 (!%p172_p9), %v1296_v0  ;;  %1095 = vmatprep.subr.mxu1 (!%p172_p9), %v1296_v0  ;;  %s1299_s7 = smov (!%p172_p9), 1   ;;  %v211_v10 = vld [vmem:[%s1559_s2] sm:$0xff] (!%p172_p9)  ;;  %vm312_vm3 = vcmask (!%p172_p9), 64512  }
  0x11   : > { %1092 = vmatprep.mubr.msk.f32.mxu0 (!%p172_p9), %vm1297_vm0, %v1296_v0  ;;  %1097 = vmatprep.mubr.msk.f32.mxu1 (!%p172_p9), %vm1297_vm0, %v1296_v0  ;;  %v213_v4 = vand.u32 (!%p172_p9), 127, %v212_v3  ;;  %s1300_s12 = smov (!%p172_p9), 96   ;;  %s1408_s13 = sand.u32 (!%p172_p9), 1, %s1286_s16  }
  0x12   : > { %s1049_s14 = sshll.u32 (!%p172_p9), %s1408_s13, 5  ;;  %s1301_s22 = smov (!%p172_p9), 64  }
  0x13   : > { %v214_v5 = vand.u32 (!%p172_p9), 1, %v213_v4  ;;  %s1411_s20 = scalar_lea.vmem (!%p172_p9), [#allocation4], %s1049_s14  ;;  %s1302_s23 = smov (!%p172_p9), 32  }
  0x14   : > { %s1303_s8 = smov (!%p172_p9), [#allocation4]  }
  0x15   : > { %vm215_vm1 = vcmp.eq.s32.totalorder (!%p172_p9), %v214_v5, 0  ;;  %s1204_s9 = sshll.u32 (!%p172_p9), %s1303_s8, 4  ;;  %s1205_s9 = int_to_ptr.vmem [resolvable:$false] %s1204_s9 }
  0x16   : > { %s1206_s10 = scalar_lea.vmem (!%p172_p9), %s1205_s9, 1024 }
  0x17   : > { %s203_s27 = scalar_select %p202_p10, %s1353_s19, 1 }
  0x19   : > { %s1130_s28 = smul.u32 24, %s203_s27  ;;  %s950_s27 = sshll.u32 %s1411_s20, 4  ;;  %s1472_s27 = int_to_ptr.vmem [resolvable:$true] %s950_s27 }
  0x1a   : > { %p1207_p0 = scmp.lt.s32.totalorder %s1472_s27, %s1205_s9 }
  0x1b   : > { %s1387_s5 = scalar_lea.vmem %s1557_s0, %s1130_s28  ;;  %s1073_s28 = sshll.u32 %s1353_s19, 9 }
  0x1c   : > { %v208_v1 = vld [vmem:[%s1387_s5 + $0x8] sm:$0xff]  ;;  %v207_v2 = vld [vmem:[%s1387_s5] sm:$0xff]  ;;  %v1422_v31 = vld [vmem:[%s1387_s5 + $0x10] sm:$0xff]  ;;  %s1478_s5 = scalar_lea.hbm %s1561_s4, %s1073_s28 }
  0x1d   : > { %226 = vrot.lane.b32.xlu0 %v208_v1, %s1298_s6  ;;  %228 = vrot.lane.b32.xlu1 %v208_v1, %s1299_s7  ;;  %v232_v11 = vmul.f32 %v210_v6, %v208_v1  ;;  %v222_v17 = vmul.f32 %v210_v6, %v207_v2 }
  0x1e   : > { %1096 = vmatpush3.msra.mxu1 %v1422_v31 }
  0x1f   : > { %1100 = vmatprep.subr.mxu1 %v1296_v0 }
  0x21   : > { %216 = vrot.lane.b32.xlu0 %v207_v2, %s1298_s6  ;;  %218 = vrot.lane.b32.xlu1 %v207_v2, %s1299_s7  ;;  %s924_s6 = scalar_lea.sflag [#allocation5], %s1408_s13  ;;  %s1200_s7 = scalar_lea.vmem %s1472_s27, 512 }
  0x22   : > { %p1201_p11 = scmp.ne.s32.totalorder %s1472_s27, %s1200_s7  ;;  %p1208_p1 = scmp.lt.s32.totalorder %s1206_s10, %s1200_s7 }
  0x24   : > { %p1202_p12 = pnand %p1201_p11, %p1370_p5  ;;  %p1209_p2 = por %p1208_p1, %p1207_p0 }
  0x26   : > { %p1203_p13 = pneg %p1202_p12 }
  0x28   : > { %p1210_p3 = pnand %p1209_p2, %p1203_p13 }
  0x8f   : > { %v227_v7 = vpop.permute.xlu0 %226  ;;  %v229_v8 = vpop.permute.xlu1 %228 }
  0x90   : > { %v230_v9 = vsub.f32 0.0, %v227_v7 }
  0x92   : > { %v231_v12 = vsel %vm215_vm1, %v230_v9, %v229_v8 }
  0x93   : > { %v233_v13 = vmul.f32 %v231_v12, %v211_v10  ;;  %v217_v14 = vpop.permute.xlu0 %216  ;;  %v219_v15 = vpop.permute.xlu1 %218 }
  0x94   : > { %v220_v16 = vsub.f32 0.0, %v217_v14 }
  0x95   : > { %v234_v18 = vadd.f32 %v233_v13, %v232_v11 }
  0x96   : > { %v221_v19 = vsel %vm215_vm1, %v220_v16, %v219_v15 }
  0x97   : > { %v223_v20 = vmul.f32 %v221_v19, %v211_v10  ;;  %1091 = vmatpush3.xpose.msk.msra.mxu0 %vm235_vm2, %v234_v18 }
  0x98   : > { %1105 = vmatprep.subr.mxu0 %v1296_v0 }
  0x99   : > { %v224_v21 = vadd.f32 %v223_v20, %v222_v17 }
  0x9b   : > { %v225_v22 = vmul.f32 0.088388346, %v224_v21 }
  0x9d   : > { %398 = vrot.lane.b32.xlu1 %v225_v22, %s1300_s12  ;;  %1093 = vmatmul.mubr.msk.f32.vlgmr.msra.gmra.mrb[0].mxu0 %vm235_vm2, %v225_v22 }
  0x9e   : > { %1107 = vmatprep.mubr.msk.f32.mxu0 %vm1297_vm0, %v1296_v0 }
 0x10f   : > { %v399_v32 = vpop.permute.xlu1 %398 }
 0x170   : > { %v308_v23 = vpop.f32.mrb[0].mxu0 }
 0x171   : > { %313 = vst.msk [vmem:[%s1411_s20] sm:$0xff] %vm312_vm3, %v308_v23  ;;  %v1094_v24 = vpop.f32.mrb[1].mxu0  ;;  %v314_v25 = vsel %vm312_vm3, %v308_v23, -inf }
 0x172   : > { %315 = vmax.xlane.f32.xlu0 %v314_v25 }
 0x188   : > { %400 = vrot.lane.b32.xlu0 %v234_v18, %s1300_s12 }
 0x18c   : > { %568 = vrot.lane.b32.xlu0 %v234_v18, %s1301_s22 }
 0x190   : > { %735 = vrot.lane.b32.xlu0 %v234_v18, %s1302_s23 }
 0x1ff   : > { %v316_v26 = vpop.xlane.xlu0 %315 }
 0x200   : > { %v317_v27 = vsub.f32 %v308_v23, %v316_v26 }
 0x202   : > { %v318_v28 = vmul.f32 1.442695, %v317_v27 }
 0x203   : > { %v401_v34 = vpop.permute.xlu0 %400 }
 0x204   : > { %1184 = vpow2.f32 %v318_v28 }
 0x207   : > { %v569_v37 = vpop.permute.xlu0 %568 }
 0x20b   : > { %v736_v39 = vpop.permute.xlu0 %735 }
 0x20e   : > { %v1185_v29 = vpop.eup %1184 }
 0x20f   : > { %v320_v30 = vsel %vm312_vm3, %v1185_v29, 0.0 }
 0x210   : > { %321 = vadd.xlane.f32.xlu1 %v320_v30 }
 0x221   : > { %566 = vrot.lane.b32.xlu1 %v225_v22, %s1301_s22 }
 0x225   : > { %733 = vrot.lane.b32.xlu1 %v225_v22, %s1302_s23 }
 0x29d   : > { %v322_v33 = vpop.xlane.xlu1 %321 }
 0x29e   : > { %1186 = vrcp.f32 %v322_v33 }
 0x2a1   : > { %v567_v38 = vpop.permute.xlu1 %566 }
 0x2a5   : > { %v734_v40 = vpop.permute.xlu1 %733 }
 0x2a8   : > { %v1187_v35 = vpop.eup %1186 }
 0x2a9   : > { %v324_v36 = vmul.f32 %v1187_v35, %v1185_v29 }
 0x2ab   : > { %1098 = vmatmul.mubr.msk.f32.vlgmr.msra.gmra.mrb[0].mxu1 %vm312_vm3, %v324_v36 }
 0x2ac   : > { %1101 = vmatpush3.xpose.msk.msra.mxu1 %vm235_vm2, %v401_v34  ;;  %1102 = vmatprep.mubr.msk.f32.mxu1 %vm1297_vm0, %v1296_v0 }
 0x2ad   : > { %1110 = vmatprep.subr.mxu1 %v1296_v0 }
 0x2af   : > { %1103 = vmatmul.mubr.msk.f32.vlgmr.msra.gmra.mrb[2].mxu1 %vm235_vm2, %v399_v32 }
 0x2b0   : > { %1111 = vmatpush3.xpose.msk.msra.mxu1 %vm235_vm2, %v569_v37  ;;  %1112 = vmatprep.mubr.msk.f32.mxu1 %vm1297_vm0, %v1296_v0 }
 0x2b1   : > { %1120 = vmatprep.subr.mxu1 %v1296_v0 }
 0x2b3   : > { %1113 = vmatmul.mubr.msk.f32.vlgmr.msra.gmra.mrb[4].mxu1 %vm235_vm2, %v567_v38 }
 0x2b4   : > { %1121 = vmatpush3.xpose.msk.msra.mxu1 %vm235_vm2, %v736_v39  ;;  %1122 = vmatprep.mubr.msk.f32.mxu1 %vm1297_vm0, %v1296_v0 }
 0x2b7   : > { %1123 = vmatmul.mubr.msk.f32.vlgmr.msra.gmra.mrb[6].mxu1 %vm235_vm2, %v734_v40 }
 0x37e   : > { %v1442_v41 = vpop.f32.mrb[0].mxu1 }
 0x37f   : > { %v1099_v42 = vpop.f32.mrb[1].mxu1 }
 0x382   : > { %v472_v43 = vpop.f32.mrb[2].mxu1 }
 0x383   : > { %1056 = vst.msk [vmem:[%s1411_s20 + $0x8] sm:$0xff] %vm312_vm3, %v472_v43  ;;  %v1104_v44 = vpop.f32.mrb[3].mxu1  ;;  %v478_v45 = vsel %vm312_vm3, %v472_v43, -inf }
 0x384   : > { %479 = vmax.xlane.f32.xlu0 %v478_v45 }
 0x386   : > { %v640_v46 = vpop.f32.mrb[4].mxu1 }
 0x387   : > { %1060 = vst.msk [vmem:[%s1411_s20 + $0x10] sm:$0xff] %vm312_vm3, %v640_v46  ;;  %v1114_v47 = vpop.f32.mrb[5].mxu1  ;;  %v646_v48 = vsel %vm312_vm3, %v640_v46, -inf }
 0x388   : > { %647 = vmax.xlane.f32.xlu1 %v646_v48 }
 0x38a   : > { %v807_v49 = vpop.f32.mrb[6].mxu1 }
 0x38b   : > { %1064 = vst.msk [vmem:[%s1411_s20 + $0x18] sm:$0xff] %vm312_vm3, %v807_v49  ;;  %v1124_v50 = vpop.f32.mrb[7].mxu1  ;;  %v813_v51 = vsel %vm312_vm3, %v807_v49, -inf }
 0x38c   : > { %814 = vmax.xlane.f32.xlu0 %v813_v51 }
 0x399   : > { %490 = vrot.lane.b32.xlu1 %v1422_v31, %s1300_s12 }
 0x411   : > { %v480_v52 = vpop.xlane.xlu0 %479 }
 0x412   : > { %v481_v53 = vsub.f32 %v472_v43, %v480_v52 }
 0x414   : > { %v482_v54 = vmul.f32 1.442695, %v481_v53 }
 0x415   : > { %v648_v55 = vpop.xlane.xlu1 %647 }
 0x416   : > { %1188 = vpow2.f32 %v482_v54  ;;  %v649_v56 = vsub.f32 %v640_v46, %v648_v55 }
 0x418   : > { %v650_v57 = vmul.f32 1.442695, %v649_v56 }
 0x419   : > { %v815_v58 = vpop.xlane.xlu0 %814  ;;  %v491_v59 = vpop.permute.xlu1 %490 }
 0x41a   : > { %1190 = vpow2.f32 %v650_v57  ;;  %v816_v60 = vsub.f32 %v807_v49, %v815_v58  ;;  %1106 = vmatpush3.msra.mxu0 %v491_v59 }
 0x41b   : > { %1115 = vmatprep.subr.mxu0 %v1296_v0 }
 0x41c   : > { %v817_v61 = vmul.f32 1.442695, %v816_v60 }
 0x41e   : > { %1192 = vpow2.f32 %v817_v61 }
 0x420   : > { %v1189_v62 = vpop.eup %1188 }
 0x421   : > { %v484_v63 = vsel %vm312_vm3, %v1189_v62, 0.0 }
 0x422   : > { %485 = vadd.xlane.f32.xlu0 %v484_v63 }
 0x424   : > { %v1191_v1 = vpop.eup %1190 }
 0x425   : > { %v652_v2 = vsel %vm312_vm3, %v1191_v1, 0.0 }
 0x426   : > { %653 = vadd.xlane.f32.xlu1 %v652_v2 }
 0x428   : > { %v1193_v3 = vpop.eup %1192 }
 0x429   : > { %v819_v4 = vsel %vm312_vm3, %v1193_v3, 0.0 }
 0x42a   : > { %820 = vadd.xlane.f32.xlu0 %v819_v4 }
 0x437   : > { %824 = vrot.lane.b32.xlu1 %v1422_v31, %s1302_s23 }
 0x440   : > { %657 = vrot.lane.b32.xlu0 %v1422_v31, %s1301_s22 }
 0x4af   : > { %v486_v5 = vpop.xlane.xlu0 %485 }
 0x4b0   : > { %1194 = vrcp.f32 %v486_v5 }
 0x4b3   : > { %v654_v6 = vpop.xlane.xlu1 %653 }
 0x4b4   : > { %1196 = vrcp.f32 %v654_v6 }
 0x4b7   : > { %v821_v7 = vpop.xlane.xlu0 %820  ;;  %v825_v13 = vpop.permute.xlu1 %824 }
 0x4b8   : > { %1198 = vrcp.f32 %v821_v7 }
 0x4ba   : > { %v1195_v8 = vpop.eup %1194 }
 0x4bb   : > { %v488_v9 = vmul.f32 %v1195_v8, %v1189_v62  ;;  %v658_v10 = vpop.permute.xlu0 %657 }
 0x4bd   : > { %1108 = vmatmul.mubr.msk.f32.vlgmr.msra.gmra.mrb[2].mxu0 %vm312_vm3, %v488_v9 }
 0x4be   : > { %v1197_v11 = vpop.eup %1196  ;;  %1116 = vmatpush3.msra.mxu0 %v658_v10  ;;  %1117 = vmatprep.mubr.msk.f32.mxu0 %vm1297_vm0, %v1296_v0 }
 0x4bf   : > { %v656_v12 = vmul.f32 %v1197_v11, %v1191_v1  ;;  %1125 = vmatprep.subr.mxu0 %v1296_v0 }
 0x4c1   : > { %1118 = vmatmul.mubr.msk.f32.vlgmr.msra.gmra.mrb[4].mxu0 %vm312_vm3, %v656_v12 }
 0x4c2   : > { %v1199_v14 = vpop.eup %1198  ;;  %1126 = vmatpush3.msra.mxu0 %v825_v13  ;;  %1127 = vmatprep.mubr.msk.f32.mxu0 %vm1297_vm0, %v1296_v0 }
 0x4c3   : > { %v823_v15 = vmul.f32 %v1199_v14, %v1193_v3 }
 0x4c5   : > { %1128 = vmatmul.mubr.msk.f32.vlgmr.msra.gmra.mrb[6].mxu0 %vm312_vm3, %v823_v15 }
 0x590   : > { %v562_v16 = vpop.f32.mrb[2].mxu0 }
 0x591   : > { %901 = vrot.lane.b32.xlu1 %v562_v16, %s1302_s23  ;;  %v1109_v17 = vpop.f32.mrb[3].mxu0 }
 0x592   : > { %1213 = shalt.err (!%p1210_p3)
}
 0x593   : > { %s1214_s11 = scalar_lea.hbm %s1478_s5, 512  ;;  %s1218_s23 = scalar_lea.hbm %s1561_s4, 1024 }
 0x594   : > { %p1215_p4 = scmp.ne.s32.totalorder %s1478_s5, %s1214_s11  ;;  %p1219_p9 = scmp.lt.u32.totalorder %s1478_s5, %s1561_s4 }
 0x595   : > { %p1220_p10 = scmp.lt.u32.totalorder %s1218_s23, %s1214_s11  ;;  %p1222_p12 = scmp.lt.u32.totalorder %s1214_s11, %s1478_s5 }
 0x596   : > { %p1216_p7 = pnand %p1215_p4, %p1370_p5 }
 0x597   : > { %p1221_p11 = por %p1220_p10, %p1219_p9 }
 0x598   : > { %p1217_p8 = pneg %p1216_p7 }
 0x599   : > { %p1223_p13 = por %p1222_p12, %p1221_p11 }
 0x59b   : > { %p1224_p0 = pnand %p1223_p13, %p1217_p8 }
 0x59d   : > { %1227 = shalt.err (!%p1224_p0)
}
 0x59e   : > { %s1304_s30 = smov 128   ;;  %s1305_s7 = smov 8   ;;  %v729_v0 = vpop.f32.mrb[4].mxu0  ;;  %vm913_vm4 = vcmask 523264   ;;  %vm915_vm5 = vcmask 785408  }
 0x59f   : > { %1132 = dma.vmem_to_hbm [thread:$0]  (%p1370_p5), %s1472_s27, 512, %s1478_s5, %s924_s6, %s1304_s30, %s1304_s30, %s1305_s7   ;;  %v1119_v18 = vpop.f32.mrb[5].mxu0 }
 0x5a0   : > { %905 = vrot.lane.b32.xlu0 %v729_v0, %s1301_s22  ;;  %v896_v19 = vpop.f32.mrb[6].mxu0  ;;  %s1048_s8 = sshll.u32 %s1408_s13, 3  ;;  %s1068_s9 = sshll.u32 %s1353_s19, 7 }
 0x5a1   : > { %909 = vrot.lane.b32.xlu1 %v896_v19, %s1300_s12  ;;  %v1129_v20 = vpop.f32.mrb[7].mxu0  ;;  %s194_s10 = scalar_lea.vmem [#allocation2], %s1048_s8  ;;  %s1514_s12 = scalar_lea.hbm %s1560_s3, %s1068_s9 }
 0x5a2   : > { %s937_s11 = sshll.u32 %s194_s10, 4  ;;  %s919_s19 = scalar_lea.sflag [#allocation3], %s1408_s13  ;;  %s1516_s11 = int_to_ptr.vmem [resolvable:$true] %s937_s11 }
 0x5a3   : > { %s1228_s5 = scalar_lea.vmem %s1516_s11, 128  ;;  %s1306_s6 = smov [#allocation2]  }
 0x5a4   : > { %p1229_p1 = scmp.ne.s32.totalorder %s1516_s11, %s1228_s5  ;;  %s1232_s14 = sshll.u32 %s1306_s6, 4  ;;  %s1233_s14 = int_to_ptr.vmem [resolvable:$false] %s1232_s14 }
 0x5a5   : > { %s1234_s20 = scalar_lea.vmem %s1233_s14, 256  ;;  %p1235_p4 = scmp.lt.s32.totalorder %s1516_s11, %s1233_s14 }
 0x5a6   : > { %p1230_p2 = pnand %p1229_p1, %p1370_p5  ;;  %p1236_p7 = scmp.lt.s32.totalorder %s1234_s20, %s1228_s5 }
 0x5a8   : > { %p1231_p3 = pneg %p1230_p2  ;;  %p1237_p8 = por %p1236_p7, %p1235_p4 }
 0x5aa   : > { %p1238_p9 = pnand %p1237_p8, %p1231_p3 }
 0x603   : > { %v902_v21 = vpop.permute.xlu1 %901 }
 0x604   : > { %v912_v23 = vsel %vm235_vm2, %v1442_v41, %v902_v21 }
 0x612   : > { %v906_v22 = vpop.permute.xlu0 %905 }
 0x613   : > { %v914_v24 = vsel %vm913_vm4, %v912_v23, %v906_v22  ;;  %v910_v25 = vpop.permute.xlu1 %909 }
 0x614   : > { %v916_v26 = vsel %vm915_vm5, %v914_v24, %v910_v25 }
 0x615   : > { %917 = vst [vmem:[%s194_s10] sm:$0xff] %v916_v26 }
 0x616   : > { %1241 = shalt.err (!%p1238_p9)
}
 0x617   : > { %s1242_s13 = scalar_lea.hbm %s1514_s12, 128  ;;  %s1246_s29 = scalar_lea.hbm %s1560_s3, 256 }
 0x618   : > { %p1243_p10 = scmp.ne.s32.totalorder %s1514_s12, %s1242_s13  ;;  %p1247_p13 = scmp.lt.u32.totalorder %s1514_s12, %s1560_s3 }
 0x619   : > { %p1248_p0 = scmp.lt.u32.totalorder %s1246_s29, %s1242_s13  ;;  %p1250_p2 = scmp.lt.u32.totalorder %s1242_s13, %s1514_s12 }
 0x61a   : > { %p1244_p11 = pnand %p1243_p10, %p1370_p5 }
 0x61b   : > { %p1249_p1 = por %p1248_p0, %p1247_p13 }
 0x61c   : > { %p1245_p12 = pneg %p1244_p11 }
 0x61d   : > { %p1251_p3 = por %p1250_p2, %p1249_p1 }
 0x61f   : > { %p1252_p4 = pnand %p1251_p3, %p1245_p12 }
 0x621   : > { %1255 = shalt.err (!%p1252_p4)
}
 0x622   : > { %1131 = dma.vmem_to_hbm [thread:$0]  (%p1370_p5), %s1516_s11, 128, %s1514_s12, %s919_s19  }
 0x623 PF: > { %p1142_p7 = scmp.ge.s32.totalorder %s1294_s18, 2  ;;  %s965_s8 = sand.u32 1, %s1282_s15  }
 0x624   : > { %s966_s9 = scalar_lea.sflag [#allocation3], %s965_s8 }
 0x625   : > { %p1136_p8 = pnand %p1142_p7, %p1374_p6 }
 0x627   : > { %1273 = dma.done.wait (!%p1136_p8), %s966_s9, 128  }
 0x628   : > { %1275 = vsyncadd (!%p1136_p8), %s966_s9, 4294967168  ;;  %s975_s10 = scalar_lea.sflag [#allocation5], %s965_s8 }
 0x629   : > { %1277 = dma.done.wait (!%p1136_p8), %s975_s10, 512  }
 0x62a   : > { %1279 = vsyncadd (!%p1136_p8), %s975_s10, 4294966784  ;;  %p18_p5 = scmp.ge.s32.totalorder %s1357_s21, 4   ;;  %s1564_s15 = smov %s1286_s16 }
 0x62b   : > { %s1565_s16 = smov %s1290_s17  ;;  %s1566_s17 = smov %s1368_s24 }
 0x62c   : > { %s1567_s18 = smov %s1357_s21  ;;  %20 = sbr.rel (!%p18_p5) target bundleno = 5 (0x5), region = 87 }
 0x633   :  { %980 = vsyncpa [#allocation3], 1 }
 0x634   :  { %982 = vsyncpa [#allocation3 + $0x1], 1 }
 0x635   :  { %983 = vsyncpa [#allocation5], 1 }
 0x636   :  { %985 = vsyncpa [#allocation5 + $0x1], 1 }

</bundles_post_ra>
